<compile_context>
chip_gen: v7x
topology: tpu7x:2x2x1
jax: 0.10.0
libtpu: 0.0.40
codegen_flags: <defaults>
</compile_context>

<pallas_src>
import jax
import jax.numpy as jnp
from jax.experimental import pallas as pl
from jax.experimental.pallas import tpu as pltpu

IN_FEATURES = 10
OUT_FEATURES = 1

# Largest batch tile (lane width). 10 x 65536 x 4 B = 2.5 MiB per input buffer,
# double-buffered ~5 MiB + output buffers: fits v5e/v6e/v7x scoped VMEM.
MAX_BATCH_TILE = 65536

# Below this batch size, skip Pallas entirely (fixed dispatch overhead wins).
SMALL_BATCH_THRESHOLD = 1024


def _round_up(n: int, m: int) -> int:
    return ((n + m - 1) // m) * m


def linear_lane_dense_kernel(xt_ref, w_ref, b_ref, o_ref):
    # xt_ref: (IN_FEATURES, TB)  feature-major activations, batch on lanes (VMEM)
    # w_ref:  (IN_FEATURES,)     weight scalars (SMEM)
    # b_ref:  (OUT_FEATURES,)    bias scalar (SMEM)
    # o_ref:  (OUT_FEATURES, TB) lane-dense output block (VMEM)
    #
    # Unrolled scalar-times-row multiply-accumulate on the VPU; no MXU matmul
    # (K=10 / N=1 is degenerate) and no XLU sublane reduce on the critical path.
    acc = xt_ref[0:1, :] * w_ref[0] + b_ref[0]
    for f in range(1, IN_FEATURES):
        acc = acc + xt_ref[f:f + 1, :] * w_ref[f]
    o_ref[...] = acc


def simple_model_forward(x, weight, bias, *, max_batch_tile=MAX_BATCH_TILE,
                         min_pallas_batch=SMALL_BATCH_THRESHOLD):
    """Forward pass of SimpleModel: y = x @ weight.T + bias.

    x:      [B, 10] float32
    weight: [1, 10] float32 (PyTorch nn.Linear [out, in] layout)
    bias:   [1]     float32
    returns [B, 1]  float32
    """
    B = x.shape[0]
    x = x.astype(jnp.float32)
    w_row = jnp.reshape(weight, (OUT_FEATURES, IN_FEATURES)).astype(jnp.float32)
    b_vec = jnp.reshape(bias, (OUT_FEATURES,)).astype(jnp.float32)

    # Small-batch fast path: a single fused XLA dot beats pad/transpose/launch.
    if B < min_pallas_batch:
        return x @ w_row.T + b_vec[None, :]

    w_col = w_row[0]  # (IN_FEATURES,) — explicit PyTorch [out,in] -> in-major

    # Batch tile: multiple of 128 lanes, capped so (a) VMEM stays small and
    # (b) large batches give >= 2 grid steps (v7x megacore sharding).
    tb = min(max_batch_tile, _round_up(pl.cdiv(B, 2), 128))
    tb = max(tb, 128)
    grid = (pl.cdiv(B, tb),)

    # Feature-major view: batch rides the 128-lane axis so the output block is
    # lane-dense (unmasked vector stores). No explicit padding — Pallas clips
    # the ragged last block. allow_input_fusion lets XLA fuse this transpose
    # into the pallas_call operand rather than materializing xt in HBM.
    xt = x.T  # (IN_FEATURES, B)

    yt = pl.pallas_call(
        linear_lane_dense_kernel,
        out_shape=jax.ShapeDtypeStruct((OUT_FEATURES, B), jnp.float32),
        grid_spec=pl.GridSpec(
            grid=grid,
            in_specs=[
                pl.BlockSpec((IN_FEATURES, tb), lambda i: (0, i)),
                pl.BlockSpec(memory_space=pltpu.MemorySpace.SMEM),
                pl.BlockSpec(memory_space=pltpu.MemorySpace.SMEM),
            ],
            out_specs=pl.BlockSpec((OUT_FEATURES, tb), lambda i: (0, i)),
        ),
        compiler_params=pltpu.CompilerParams(
            dimension_semantics=("parallel",),
            allow_input_fusion=[True, False, False],
            vmem_limit_bytes=32 * 1024 * 1024,
        ),
        cost_estimate=pl.CostEstimate(
            flops=2 * B * IN_FEATURES,
            transcendentals=0,
            bytes_accessed=4 * (B * IN_FEATURES + B * OUT_FEATURES
                                + IN_FEATURES + OUT_FEATURES),
        ),
    )(xt, w_col, b_vec)

    # Back to the PyTorch output layout.
    return yt.T  # (B, 1)


if __name__ == "__main__":
    key = jax.random.PRNGKey(0)
    kx, kw, kb, kx2 = jax.random.split(key, 4)

    # PyTorch-layout parameters: weight [out, in] = [1, 10], bias [1].
    weight = jax.random.normal(kw, (OUT_FEATURES, IN_FEATURES), dtype=jnp.float32) * 0.3
    bias = jax.random.normal(kb, (OUT_FEATURES,), dtype=jnp.float32) * 0.1

    def ref(xv):
        return xv @ weight.T + bias

    ok = True

    # 1) Small batch (B=8): small-batch fast path (plain XLA dot).
    x_small = jax.random.normal(kx, (8, IN_FEATURES), dtype=jnp.float32)
    y_small = jax.block_until_ready(simple_model_forward(x_small, weight, bias))
    ok &= y_small.shape == (8, OUT_FEATURES)
    ok &= bool(jnp.allclose(y_small, ref(x_small), atol=1e-5, rtol=1e-5))

    # 2) Ragged batch (B=300), Pallas path forced: 2 grid steps, clipped tail block.
    x_rag = jax.random.normal(kx2, (300, IN_FEATURES), dtype=jnp.float32)
    y_rag = jax.block_until_ready(
        simple_model_forward(x_rag, weight, bias, min_pallas_batch=0))
    ok &= y_rag.shape == (300, OUT_FEATURES)
    ok &= bool(jnp.allclose(y_rag, ref(x_rag), atol=1e-5, rtol=1e-5))

    # 3) Larger batch (B=2048): Pallas path by default, 2 parallel grid steps.
    x_big = jax.random.normal(kx, (2048, IN_FEATURES), dtype=jnp.float32)
    y_big = jax.block_until_ready(simple_model_forward(x_big, weight, bias))
    ok &= y_big.shape == (2048, OUT_FEATURES)
    ok &= bool(jnp.allclose(y_big, ref(x_big), atol=1e-5, rtol=1e-5))

    assert ok
    print("KERNEL_OK")
</pallas_src>

<mosaic_0001>
module attributes {stable_mosaic.version = 11 : i64} {
  func.func @linear_lane_dense_kernel(%arg0: i32, %arg1: memref<10x256xf32, #tpu.memory_space<vmem>>, %arg2: memref<10xf32, #tpu.memory_space<smem>>, %arg3: memref<1xf32, #tpu.memory_space<smem>>, %arg4: memref<1x256xf32, #tpu.memory_space<vmem>>) attributes {dimension_semantics = [#tpu.dimension_semantics<parallel>], iteration_bounds = array<i64: 2>, scalar_prefetch = 0 : i64, scratch_operands = 0 : i64, tpu.core_type = #tpu.core_type<tc>, window_params = [{transform_indices = @transform_0, window_bounds = array<i64: 10, 256>}, {transform_indices = @transform_1, window_bounds = array<i64: 10>}, {transform_indices = @transform_2, window_bounds = array<i64: 1>}, {transform_indices = @transform_3, window_bounds = array<i64: 1, 256>}]} {
    %c0 = arith.constant 0 : index
    %c0_0 = arith.constant 0 : index
    %0 = vector.load %arg1[%c0, %c0_0] : memref<10x256xf32, #tpu.memory_space<vmem>>, vector<1x256xf32>
    %c0_1 = arith.constant 0 : index
    %1 = memref.load %arg2[%c0_1] : memref<10xf32, #tpu.memory_space<smem>>
    %2 = vector.broadcast %1 : f32 to vector<1x256xf32>
    %3 = arith.mulf %0, %2 : vector<1x256xf32>
    %c0_2 = arith.constant 0 : index
    %4 = memref.load %arg3[%c0_2] : memref<1xf32, #tpu.memory_space<smem>>
    %5 = vector.broadcast %4 : f32 to vector<1x256xf32>
    %6 = arith.addf %3, %5 : vector<1x256xf32>
    %c1 = arith.constant 1 : index
    %c0_3 = arith.constant 0 : index
    %7 = vector.load %arg1[%c1, %c0_3] : memref<10x256xf32, #tpu.memory_space<vmem>>, vector<1x256xf32>
    %c1_4 = arith.constant 1 : index
    %8 = memref.load %arg2[%c1_4] : memref<10xf32, #tpu.memory_space<smem>>
    %9 = vector.broadcast %8 : f32 to vector<1x256xf32>
    %10 = arith.mulf %7, %9 : vector<1x256xf32>
    %11 = arith.addf %6, %10 : vector<1x256xf32>
    %c2 = arith.constant 2 : index
    %c0_5 = arith.constant 0 : index
    %12 = vector.load %arg1[%c2, %c0_5] : memref<10x256xf32, #tpu.memory_space<vmem>>, vector<1x256xf32>
    %c2_6 = arith.constant 2 : index
    %13 = memref.load %arg2[%c2_6] : memref<10xf32, #tpu.memory_space<smem>>
    %14 = vector.broadcast %13 : f32 to vector<1x256xf32>
    %15 = arith.mulf %12, %14 : vector<1x256xf32>
    %16 = arith.addf %11, %15 : vector<1x256xf32>
    %c3 = arith.constant 3 : index
    %c0_7 = arith.constant 0 : index
    %17 = vector.load %arg1[%c3, %c0_7] : memref<10x256xf32, #tpu.memory_space<vmem>>, vector<1x256xf32>
    %c3_8 = arith.constant 3 : index
    %18 = memref.load %arg2[%c3_8] : memref<10xf32, #tpu.memory_space<smem>>
    %19 = vector.broadcast %18 : f32 to vector<1x256xf32>
    %20 = arith.mulf %17, %19 : vector<1x256xf32>
    %21 = arith.addf %16, %20 : vector<1x256xf32>
    %c4 = arith.constant 4 : index
    %c0_9 = arith.constant 0 : index
    %22 = vector.load %arg1[%c4, %c0_9] : memref<10x256xf32, #tpu.memory_space<vmem>>, vector<1x256xf32>
    %c4_10 = arith.constant 4 : index
    %23 = memref.load %arg2[%c4_10] : memref<10xf32, #tpu.memory_space<smem>>
    %24 = vector.broadcast %23 : f32 to vector<1x256xf32>
    %25 = arith.mulf %22, %24 : vector<1x256xf32>
    %26 = arith.addf %21, %25 : vector<1x256xf32>
    %c5 = arith.constant 5 : index
    %c0_11 = arith.constant 0 : index
    %27 = vector.load %arg1[%c5, %c0_11] : memref<10x256xf32, #tpu.memory_space<vmem>>, vector<1x256xf32>
    %c5_12 = arith.constant 5 : index
    %28 = memref.load %arg2[%c5_12] : memref<10xf32, #tpu.memory_space<smem>>
    %29 = vector.broadcast %28 : f32 to vector<1x256xf32>
    %30 = arith.mulf %27, %29 : vector<1x256xf32>
    %31 = arith.addf %26, %30 : vector<1x256xf32>
    %c6 = arith.constant 6 : index
    %c0_13 = arith.constant 0 : index
    %32 = vector.load %arg1[%c6, %c0_13] : memref<10x256xf32, #tpu.memory_space<vmem>>, vector<1x256xf32>
    %c6_14 = arith.constant 6 : index
    %33 = memref.load %arg2[%c6_14] : memref<10xf32, #tpu.memory_space<smem>>
    %34 = vector.broadcast %33 : f32 to vector<1x256xf32>
    %35 = arith.mulf %32, %34 : vector<1x256xf32>
    %36 = arith.addf %31, %35 : vector<1x256xf32>
    %c7 = arith.constant 7 : index
    %c0_15 = arith.constant 0 : index
    %37 = vector.load %arg1[%c7, %c0_15] : memref<10x256xf32, #tpu.memory_space<vmem>>, vector<1x256xf32>
    %c7_16 = arith.constant 7 : index
    %38 = memref.load %arg2[%c7_16] : memref<10xf32, #tpu.memory_space<smem>>
    %39 = vector.broadcast %38 : f32 to vector<1x256xf32>
    %40 = arith.mulf %37, %39 : vector<1x256xf32>
    %41 = arith.addf %36, %40 : vector<1x256xf32>
    %c8 = arith.constant 8 : index
    %c0_17 = arith.constant 0 : index
    %42 = vector.load %arg1[%c8, %c0_17] : memref<10x256xf32, #tpu.memory_space<vmem>>, vector<1x256xf32>
    %c8_18 = arith.constant 8 : index
    %43 = memref.load %arg2[%c8_18] : memref<10xf32, #tpu.memory_space<smem>>
    %44 = vector.broadcast %43 : f32 to vector<1x256xf32>
    %45 = arith.mulf %42, %44 : vector<1x256xf32>
    %46 = arith.addf %41, %45 : vector<1x256xf32>
    %c9 = arith.constant 9 : index
    %c0_19 = arith.constant 0 : index
    %47 = vector.load %arg1[%c9, %c0_19] : memref<10x256xf32, #tpu.memory_space<vmem>>, vector<1x256xf32>
    %c9_20 = arith.constant 9 : index
    %48 = memref.load %arg2[%c9_20] : memref<10xf32, #tpu.memory_space<smem>>
    %49 = vector.broadcast %48 : f32 to vector<1x256xf32>
    %50 = arith.mulf %47, %49 : vector<1x256xf32>
    %51 = arith.addf %46, %50 : vector<1x256xf32>
    %c0_21 = arith.constant 0 : index
    %c0_22 = arith.constant 0 : index
    %52 = vector.load %arg4[%c0_21, %c0_22] : memref<1x256xf32, #tpu.memory_space<vmem>>, vector<1x256xf32>
    tpu.vector_store %arg4[%c0_21, %c0_22], %51 {strides = array<i32>} : memref<1x256xf32, #tpu.memory_space<vmem>>, vector<1x256xf32>,
    return
  }
  func.func @transform_0(%arg0: i32) -> (i32, i32) {
    %c0_i32 = arith.constant 0 : i32
    %c0_i32_0 = arith.constant 0 : i32
    return %c0_i32, %arg0 : i32, i32
  }
  func.func @transform_1(%arg0: i32) -> i32 {
    %c0_i32 = arith.constant 0 : i32
    %c0_i32_0 = arith.constant 0 : i32
    return %c0_i32 : i32
  }
  func.func @transform_2(%arg0: i32) -> i32 {
    %c0_i32 = arith.constant 0 : i32
    %c0_i32_0 = arith.constant 0 : i32
    return %c0_i32 : i32
  }
  func.func @transform_3(%arg0: i32) -> (i32, i32) {
    %c0_i32 = arith.constant 0 : i32
    %c0_i32_0 = arith.constant 0 : i32
    return %c0_i32, %arg0 : i32, i32
  }
}

</mosaic_0001>

<bundles_post_ra>
// kernel: tpu_custom_call.1
= control target key start
LH: loop header
LB: loop body
LE: loop exit
PB: predicated region body
PF: predicated region fallthrough
CT: control target
= control target key end

     0   :  { %s837_s0 = inlined_call_operand.hbm [shape: f32[10,300], index: 0, kind: input, shape index: {}]   ;;  %s838_s1 = inlined_call_operand.vmem [shape: f32[10], index: 1, kind: input, shape index: {}]   ;;  %s839_s2 = inlined_call_operand.<no memory space> [shape: f32[1], index: 2, kind: input, shape index: {}]   ;;  %s840_s3 = inlined_call_operand.hbm [shape: f32[1,300], index: 3, kind: output, shape index: {}]  }
   0x1   :  { %8 = sst [smem:[#allocation2]] %s839_s2 }
   0x2   :  { %9 = vsyncpa [#allocation4], 0 }
   0x3   :  { %11 = vsyncpa [#allocation4 + $0x1], 0 }
   0x4   :  { %12 = vsyncpa [#allocation6], 0 }
   0x5   :  { %13 = vsyncpa [#allocation5], 0 }
   0x6   :  { %15 = vsyncpa [#allocation5 + $0x1], 0  ;;  %s629_s14 = smov 0   ;;  %s631_s15 = smov 0  }
   0x7   :  { %s633_s16 = smov 0   ;;  %s635_s17 = smov 0  }
   0x8 LB: > { %s650_s2 = sadd.s32 4294967295, %s599_s17   ;;  %s389_s18 = sadd.s32 4294967294, %s599_s17   ;;  %s599_s17 = sphi %s635_s17, %s855_s17   ;;  %s595_s16 = sphi %s633_s16, %s854_s16   ;;  %s591_s15 = sphi %s631_s15, %s853_s15   ;;  %s587_s14 = sphi %s629_s14, %s852_s14  }
   0x9   : > { %s654_s19 = sadd.s32 1, %s599_s17   ;;  %s28_s20 = sadd.s32 1, %s595_s16 }
   0xa   : > { %s25_s21 = ssub.s32 %s599_s17, %s654_s19  ;;  %p35_p0 = scmp.ne.s32.totalorder %s595_s16, %s591_s15 }
   0xb   : > { %p26_p1 = scmp.eq.s32.totalorder %s25_s21, 0  ;;  %p36_p2 = scmp.eq.s32.totalorder %s599_s17, 0 }
   0xc   : > { %p41_p3 = scmp.ne.s32.totalorder %s591_s15, %s587_s14  ;;  %p42_p4 = scmp.eq.s32.totalorder %s650_s2, 0 }
   0xd   : > { %s666_s22 = scalar_select %p26_p1, %s595_s16, %s28_s20  }
   0xe   : > { %p668_p5 = por %p36_p2, %p35_p0  ;;  %p674_p6 = por %p42_p4, %p41_p3 }
   0xf   : > { %p107_p7 = scmp.eq.s32.totalorder %s650_s2, 1  ;;  %p113_p8 = scmp.eq.s32.totalorder %s389_s18, 1 }
  0x10   : > { %s844_s24 = scalar_select %p674_p6, 1, 0 }
  0x11   : > { %p390_p9 = scmp.ge.s32.totalorder %s599_s17, 1  ;;  %p120_p10 = scmp.lt.s32.totalorder %s599_s17, 3 }
  0x12   : > { %p681_p11 = por %p107_p7, %p35_p0  ;;  %p685_p12 = por %p113_p8, %p41_p3 }
  0x13   : > { %p689_p13 = pnand %p390_p9, %p120_p10  ;;  %s133_s30 = sshll.u32 %s838_s1, 4  ;;  %s134_s30 = int_to_ptr.vmem [resolvable:$true] %s133_s30 }
  0x14   : > { %s845_s25 = scalar_select %p681_p11, 1, 0 }
  0x15   : > { %s846_s26 = scalar_select %p685_p12, 1, 0 }
  0x16   : > { %p440_p1 = pneg %p689_p13  ;;  %s486_s4 = scalar_lea.vmem %s134_s30, 16 }
  0x17   : > { %p487_p2 = scmp.ne.s32.totalorder %s134_s30, %s486_s4  ;;  %p494_p12 = scmp.lt.s32.totalorder %s134_s30, %s134_s30 }
  0x18   : > { %p441_p0 = pnand %p440_p1, %p42_p4  ;;  %p495_p9 = scmp.lt.s32.totalorder %s486_s4, %s486_s4 }
  0x1a   : > { %p488_p3 = pneg %p441_p0  ;;  %p496_p10 = por %p495_p9, %p494_p12 }
  0x1c   : > { %p489_p7 = pnand %p488_p3, %p487_p2 }
  0x1e   : > { %p490_p8 = pneg %p489_p7 }
  0x20   : > { %p497_p11 = pnand %p496_p10, %p490_p8 }
  0x22   : > { %500 = shalt.err (!%p497_p11)
}
  0x23   : > { %s601_s5 = smov [#allocation7]   ;;  %p842_p6 = scmp.ge.s32.totalorder %s599_s17, 2 }
  0x24   : > { %443 = dma.vmem_to_smem (!%p441_p0), %s134_s30, 16, %s601_s5, [#allocation6]  }
  0x25   : > { %143 = sbr.rel (%p842_p6) target bundleno = 79 (0x4f), region = 24 }
  0x2c   : > { %146 = sbr.rel (!%p668_p5) target bundleno = 79 (0x4f), region = 28  ;;  %s147_s6 = sand.u32 (%p668_p5), 1, %s595_s16  }
  0x2d   : > { %s394_s7 = sshll.u32 (%p668_p5), %s599_s17, 1  ;;  %s393_s8 = sshll.u32 (%p668_p5), %s147_s6, 5 }
  0x2e   : > { %s153_s9 = ssub.s32 (%p668_p5), 3, %s394_s7  ;;  %s713_s12 = scalar_lea.sflag (%p668_p5), [#allocation4], %s147_s6 }
  0x2f   : > { %p154_p1 = scmp.lt.s32.totalorder (%p668_p5), %s153_s9, 2  ;;  %s151_s13 = scalar_lea.vmem (%p668_p5), [#allocation3], %s393_s8 }
  0x33   : > { %s857_s9 = smov (!%p154_p1, %s153_s9), 2 }
  0x34   : > { %s710_s10 = sshll.u32 %s857_s9, 8 }
  0x35   : > { %s158_s11 = ssub.s32 512, %s710_s10 }
  0x36   : > { %159 = vsyncadd %s713_s12, %s158_s11  ;;  %p396_p5 = scmp.ne.s32.totalorder %s710_s10, 0  ;;  %s430_s18 = sshll.u32 %s599_s17, 8 }
  0x37   : > { %s721_s23 = scalar_lea.hbm %s837_s0, %s430_s18  ;;  %s398_s28 = sshll.u32 %s857_s9, 3 }
  0x38   : > { %s165_s29 = sshll.u32 %s151_s13, 4  ;;  %s501_s30 = scalar_lea.hbm %s721_s23, %s710_s10  ;;  %s724_s29 = int_to_ptr.vmem [resolvable:$true] %s165_s29 }
  0x39   : > { %p502_p11 = scmp.ne.s32.totalorder %s721_s23, %s501_s30  ;;  %s505_s6 = scalar_lea.hbm %s837_s0, 768 }
  0x3a   : > { %p506_p2 = scmp.lt.u32.totalorder %s721_s23, %s837_s0  ;;  %p507_p3 = scmp.lt.u32.totalorder %s505_s6, %s501_s30 }
  0x3b   : > { %p503_p12 = pnand %p502_p11, %p396_p5  ;;  %p509_p8 = scmp.lt.u32.totalorder %s501_s30, %s721_s23 }
  0x3c   : > { %p508_p7 = por %p507_p3, %p506_p2 }
  0x3d   : > { %p504_p0 = pneg %p503_p12 }
  0x3e   : > { %p510_p9 = por %p509_p8, %p508_p7 }
  0x40   : > { %p511_p10 = pnand %p510_p9, %p504_p0 }
  0x42   : > { %514 = shalt.err (!%p511_p10)
}
  0x43   : > { %s515_s11 = scalar_lea.vmem %s724_s29, %s710_s10  ;;  %s602_s13 = smov [#allocation3]  }
  0x44   : > { %p516_p1 = scmp.ne.s32.totalorder %s724_s29, %s515_s11  ;;  %s519_s18 = sshll.u32 %s602_s13, 4  ;;  %s520_s18 = int_to_ptr.vmem [resolvable:$false] %s519_s18 }
  0x45   : > { %s521_s20 = scalar_lea.vmem %s520_s18, 1024  ;;  %p522_p6 = scmp.lt.s32.totalorder %s724_s29, %s520_s18 }
  0x46   : > { %p517_p11 = pnand %p516_p1, %p396_p5  ;;  %p523_p2 = scmp.lt.s32.totalorder %s521_s20, %s515_s11 }
  0x48   : > { %p518_p12 = pneg %p517_p11  ;;  %p524_p3 = por %p523_p2, %p522_p6 }
  0x4a   : > { %p525_p7 = pnand %p524_p3, %p518_p12 }
  0x4c   : > { %528 = shalt.err (!%p525_p7)
}
  0x4d   : > { %s603_s21 = smov 384   ;;  %s604_s30 = smov 256  }
  0x4e   : > { %171 = dma.hbm_to_vmem [thread:$0]  (%p396_p5), %s721_s23, %s710_s10, %s724_s29, %s713_s12, %s603_s21, %s604_s30, %s398_s28  }
  0x4f PF: > { %177 = sbr.rel (%p689_p13) target bundleno = 148 (0x94), region = 32  ;;  %s756_s4 = sand.u32 (!%p689_p13), 1, %s591_s15  }
  0x50   : > { %s402_s5 = sshll.u32 (!%p689_p13), %s756_s4, 5  ;;  %s180_s6 = scalar_lea.sflag (!%p689_p13), [#allocation4], %s756_s4 }
  0x51   : > { %s760_s7 = scalar_lea.vmem (!%p689_p13), [#allocation3], %s402_s5  ;;  %p848_p6 = scmp.ne.s32.totalorder (!%p689_p13), %s844_s24, 0 }
  0x56   : > { %574 = dma.done.wait (%p848_p6), %s180_s6, 512  }
  0x57   : > { %576 = vsyncadd (%p848_p6), %s180_s6, 4294966784 }
  0x58   : > { %578 = dma.done.wait (%p42_p4), [#allocation6], 16  }
  0x59   : > { %580 = vsyncadd (%p42_p4), [#allocation6], 4294967280 }
  0x5a   : > { %192 = sfence }
  0x5b   : > { %s222_s27 = sld [smem:[#allocation7]]  ;;  %s406_s10 = sld [smem:[#allocation7 + $0x1]]  ;;  %v221_v0 = vld [vmem:[%s760_s7] ss:$8 sm:$0x3]  ;;  %v282_v37 = vlaneseq }
  0x5c   : > { %s225_s9 = sld [smem:[#allocation2]]  ;;  %s408_s12 = sld [smem:[#allocation7 + $0x2]]  ;;  %v405_v2 = vld [vmem:[%s760_s7 + $0x1] ss:$8 sm:$0x3] }
  0x5d   : > { %s410_s23 = sld [smem:[#allocation7 + $0x3]]  ;;  %s412_s28 = sld [smem:[#allocation7 + $0x4]]  ;;  %v407_v5 = vld [vmem:[%s760_s7 + $0x2] ss:$8 sm:$0x3]  ;;  %vm284_vm0 = vcmp.lt.s32.totalorder %v282_v37, 256 }
  0x5e   : > { %s414_s24 = sld [smem:[#allocation7 + $0x5]]  ;;  %s416_s29 = sld [smem:[#allocation7 + $0x6]]  ;;  %v409_v7 = vld [vmem:[%s760_s7 + $0x3] ss:$8 sm:$0x3] }
  0x5f   : > { %s418_s8 = sld [smem:[#allocation7 + $0x7]]  ;;  %v411_v13 = vld [vmem:[%s760_s7 + $0x4] ss:$8 sm:$0x3]  ;;  %s420_s11 = sld [smem:[#allocation7 + $0x8]] }
  0x60   : > { %v413_v17 = vld [vmem:[%s760_s7 + $0x5] ss:$8 sm:$0x3]  ;;  %s422_s13 = sld [smem:[#allocation7 + $0x9]]  ;;  %s404_s18 = sshll.u32 %s756_s4, 1 }
  0x61   : > { %v223_v1 = vstv %s222_s27  ;;  %v231_v6 = vstv %s406_s10  ;;  %v415_v21 = vld [vmem:[%s760_s7 + $0x6] ss:$8 sm:$0x3]  ;;  %v417_v25 = vld [vmem:[%s760_s7 + $0x7] ss:$8 sm:$0x3] }
  0x62   : > { %v224_v3 = vmul.f32 %v223_v1, %v221_v0  ;;  %v226_v4 = vstv %s225_s9  ;;  %v232_v9 = vmul.f32 %v405_v2, %v231_v6  ;;  %v237_v10 = vstv %s408_s12  ;;  %v419_v29 = vld [vmem:[%s760_s7 + $0x10] ss:$8 sm:$0x3]  ;;  %v421_v33 = vld [vmem:[%s760_s7 + $0x11] ss:$8 sm:$0x3] }
  0x63   : > { %v238_v11 = vmul.f32 %v407_v5, %v237_v10  ;;  %v243_v12 = vstv %s410_s23  ;;  %v249_v16 = vstv %s412_s28  ;;  %s210_s20 = scalar_lea.vmem [#allocation8], %s404_s18  ;;  %s288_s21 = scalar_lea.sflag [#allocation5], %s756_s4 }
  0x64   : > { %v227_v8 = vadd.f32 %v226_v4, %v224_v3  ;;  %v244_v15 = vmul.f32 %v409_v7, %v243_v12  ;;  %v255_v18 = vstv %s414_s24  ;;  %v250_v20 = vmul.f32 %v411_v13, %v249_v16  ;;  %p849_p4 = scmp.ne.s32.totalorder %s845_s25, 0 }
  0x65   : > { %v261_v22 = vstv %s416_s29  ;;  %v256_v24 = vmul.f32 %v413_v17, %v255_v18  ;;  %v267_v26 = vstv %s418_s8  ;;  %v273_v30 = vstv %s420_s11  ;;  %s424_s30 = sshll.u32 (%p849_p4), %s650_s2, 1 }
  0x66   : > { %v233_v14 = vadd.f32 %v232_v9, %v227_v8  ;;  %v262_v28 = vmul.f32 %v415_v21, %v261_v22  ;;  %v268_v32 = vmul.f32 %v417_v25, %v267_v26  ;;  %v279_v34 = vstv %s422_s13  ;;  %s296_s5 = ssub.s32 (%p849_p4), 3, %s424_s30 }
  0x67   : > { %v274_v36 = vmul.f32 %v419_v29, %v273_v30  ;;  %v280_v39 = vmul.f32 %v421_v33, %v279_v34  ;;  %p297_p13 = scmp.lt.s32.totalorder (%p849_p4), %s296_s5, 2 }
  0x68   : > { %v239_v19 = vadd.f32 %v238_v11, %v233_v14 }
  0x6a   : > { %v245_v23 = vadd.f32 %v244_v15, %v239_v19 }
  0x6c   : > { %v251_v27 = vadd.f32 %v250_v20, %v245_v23 }
  0x6e   : > { %v257_v31 = vadd.f32 %v256_v24, %v251_v27 }
  0x70   : > { %v263_v35 = vadd.f32 %v262_v28, %v257_v31 }
  0x72   : > { %v269_v38 = vadd.f32 %v268_v32, %v263_v35  ;;  %294 = sbr.rel (!%p849_p4) target bundleno = 148 (0x94), region = 44 }
  0x74   : > { %v275_v40 = vadd.f32 %v274_v36, %v269_v38 }
  0x76   : > { %v281_v41 = vadd.f32 %v280_v39, %v275_v40 }
  0x78   : > { %286 = vst.msk [vmem:[%s210_s20] sm:$0x3] %vm284_vm0, %v281_v41 }
  0x79   : > { %s859_s5 = smov (!%p297_p13, %s296_s5), 2 }
  0x7a   : > { %s785_s6 = sshll.u32 %s859_s5, 4 }
  0x7b   : > { %s301_s7 = ssub.s32 32, %s785_s6 }
  0x7c   : > { %302 = vsyncadd %s288_s21, %s301_s7  ;;  %p426_p5 = scmp.ne.s32.totalorder %s785_s6, 0  ;;  %s433_s27 = sshll.u32 %s650_s2, 5 }
  0x7d   : > { %s795_s10 = scalar_lea.hbm %s840_s3, %s433_s27  ;;  %s307_s12 = sshll.u32 %s210_s20, 4  ;;  %s308_s12 = int_to_ptr.vmem [resolvable:$true] %s307_s12 }
  0x7e   : > { %s529_s23 = scalar_lea.vmem %s308_s12, %s785_s6  ;;  %s605_s28 = smov [#allocation8]  }
  0x7f   : > { %p530_p0 = scmp.ne.s32.totalorder %s308_s12, %s529_s23  ;;  %s533_s24 = sshll.u32 %s605_s28, 4  ;;  %s534_s24 = int_to_ptr.vmem [resolvable:$false] %s533_s24 }
  0x80   : > { %s535_s29 = scalar_lea.vmem %s534_s24, 64  ;;  %p536_p10 = scmp.lt.s32.totalorder %s308_s12, %s534_s24 }
  0x81   : > { %p531_p8 = pnand %p530_p0, %p426_p5  ;;  %p537_p1 = scmp.lt.s32.totalorder %s535_s29, %s529_s23 }
  0x83   : > { %p532_p9 = pneg %p531_p8  ;;  %p538_p11 = por %p537_p1, %p536_p10 }
  0x85   : > { %p539_p12 = pnand %p538_p11, %p532_p9 }
  0x87   : > { %542 = shalt.err (!%p539_p12)
}
  0x88   : > { %s543_s2 = scalar_lea.hbm %s795_s10, %s785_s6  ;;  %s547_s13 = scalar_lea.hbm %s840_s3, 48 }
  0x89   : > { %p544_p2 = scmp.ne.s32.totalorder %s795_s10, %s543_s2  ;;  %p548_p6 = scmp.lt.u32.totalorder %s795_s10, %s840_s3 }
  0x8a   : > { %p549_p4 = scmp.lt.u32.totalorder %s547_s13, %s543_s2  ;;  %p551_p0 = scmp.lt.u32.totalorder %s543_s2, %s795_s10 }
  0x8b   : > { %p545_p3 = pnand %p544_p2, %p426_p5 }
  0x8c   : > { %p550_p13 = por %p549_p4, %p548_p6 }
  0x8d   : > { %p546_p7 = pneg %p545_p3 }
  0x8e   : > { %p552_p8 = por %p551_p0, %p550_p13 }
  0x90   : > { %p553_p9 = pnand %p552_p8, %p546_p7 }
  0x92   : > { %556 = shalt.err (!%p553_p9)
}
  0x93   : > { %310 = dma.vmem_to_hbm [thread:$0]  (%p426_p5), %s308_s12, %s785_s6, %s795_s10, %s288_s21  }
  0x94 PF: > { %s319_s30 = sand.u32 1, %s587_s14   ;;  %p850_p10 = scmp.ne.s32.totalorder %s846_s26, 0 }
  0x95   : > { %p851_p1 = scmp.ge.s32.totalorder %s599_s17, 2  ;;  %s320_s5 = scalar_lea.sflag [#allocation5], %s319_s30 }
  0x97   : > { %p445_p11 = pnand %p851_p1, %p850_p10 }
  0x99   : > { %582 = dma.done.wait (!%p445_p11), %s320_s5, 32  }
  0x9a   : > { %584 = vsyncadd (!%p445_p11), %s320_s5, 4294967264  ;;  %p18_p12 = scmp.ge.s32.totalorder %s654_s19, 4   ;;  %s852_s14 = smov %s591_s15 }
  0x9b   : > { %s853_s15 = smov %s595_s16  ;;  %s854_s16 = smov %s666_s22 }
  0x9c   : > { %s855_s17 = smov %s654_s19  ;;  %20 = sbr.rel (!%p18_p12) target bundleno = 8 (0x8), region = 91 }
  0xa3   :  { %325 = vsyncpa [#allocation4], 1 }
  0xa4   :  { %327 = vsyncpa [#allocation4 + $0x1], 1 }
  0xa5   :  { %328 = vsyncpa [#allocation5], 1 }
  0xa6   :  { %330 = vsyncpa [#allocation5 + $0x1], 1 }
  0xa7   :  { %331 = vsyncpa [#allocation6], 1 }
  0xa8   :  { %333 = vsyncpa [#allocation6 + $0x1], 1 }

</bundles_post_ra>
